<compile_context>
chip_gen: v5e
topology: v5e:2x2
jax: 0.10.0
libtpu: 0.0.40
codegen_flags: <defaults>
</compile_context>

<pallas_src>
import math

import jax
import jax.numpy as jnp
from jax.experimental import pallas as pl
from jax.experimental.pallas import tpu as pltpu


# ------------------------------ small helpers --------------------------------

def _round_up(x, m):
    return ((x + m - 1) // m) * m


def _hann_window(win):
    # torch.hann_window(win), periodic: 0.5 - 0.5*cos(2*pi*n/win)
    n = jnp.arange(win, dtype=jnp.float32)
    return 0.5 - 0.5 * jnp.cos(2.0 * math.pi * n / win)


def _fused_basis(win, f_pad):
    """(win, 2*f_pad) bf16 DFT basis: [:, :F] = w*cos, [:, f_pad:f_pad+F] = -w*sin."""
    F = win // 2 + 1
    n = jnp.arange(win, dtype=jnp.float32)[:, None]
    f = jnp.arange(F, dtype=jnp.float32)[None, :]
    ang = 2.0 * math.pi * n * f / win
    w = _hann_window(win)[:, None]
    basis = jnp.zeros((win, 2 * f_pad), jnp.float32)
    basis = basis.at[:, :F].set(w * jnp.cos(ang))
    basis = basis.at[:, f_pad:f_pad + F].set(-(w * jnp.sin(ang)))
    return basis.astype(jnp.bfloat16)


def _frame(x, win, hop):
    # torch.stft(center=True, pad_mode='constant'): zero pad win//2 both sides,
    # n_frames = T // hop + 1.
    B, T = x.shape
    pad = win // 2
    xp = jnp.pad(x, ((0, 0), (pad, pad)))
    n_frames = T // hop + 1
    idx = jnp.arange(n_frames)[:, None] * hop + jnp.arange(win)[None, :]
    return xp[:, idx]                                    # (B, n_frames, win)


def _stacked_frames(target, estimate, win, hop, tile_m, m_pad):
    """Interleaved-by-tile bf16 frames (n_tiles*2*tile_m, win): tile i holds
    [target frame tile i ; estimate frame tile i]; zero rows pad the tail."""
    B, _ = target.shape
    tf = _frame(target.astype(jnp.bfloat16), win, hop)   # bf16 cast BEFORE the gather
    ef = _frame(estimate.astype(jnp.bfloat16), win, hop)
    M = B * tf.shape[1]
    n_tiles = m_pad // tile_m
    tf = jnp.pad(tf.reshape(M, win), ((0, m_pad - M), (0, 0))).reshape(n_tiles, tile_m, win)
    ef = jnp.pad(ef.reshape(M, win), ((0, m_pad - M), (0, 0))).reshape(n_tiles, tile_m, win)
    return jnp.concatenate([tf, ef], axis=1).reshape(n_tiles * 2 * tile_m, win)


def _vmem_capacity_bytes():
    try:
        return int(pltpu.get_tpu_info().vmem_capacity_bytes)
    except Exception:
        pass
    try:
        kind = jax.devices()[0].device_kind.lower()
        if "v7" in kind or "7x" in kind:
            return 64 << 20
    except Exception:
        pass
    return 128 << 20


_BUFFERED_OK = None


def _single_buffer_ok():
    """Probe once whether pipeline_mode=pl.Buffered(1) (single-buffered constant
    operand) is supported by the running JAX; fall back to default buffering."""
    global _BUFFERED_OK
    if _BUFFERED_OK is None:
        try:
            with jax.ensure_compile_time_eval():
                spec = pl.BlockSpec((8, 128), lambda i: (0, 0),
                                    pipeline_mode=pl.Buffered(1))

                def _k(x_ref, o_ref):
                    o_ref[...] = x_ref[...] + 1.0

                out = pl.pallas_call(
                    _k,
                    out_shape=jax.ShapeDtypeStruct((8, 128), jnp.float32),
                    grid=(2,),
                    in_specs=[spec],
                    out_specs=pl.BlockSpec((8, 128), lambda i: (0, 0)),
                )(jnp.zeros((8, 128), jnp.float32))
                jax.block_until_ready(out)
            _BUFFERED_OK = True
        except Exception:
            _BUFFERED_OK = False
    return _BUFFERED_OK


# ------------------------------ Pallas kernels --------------------------------

_MAG_EPS = 1e-12     # inside sqrt: keeps d|z|/dz finite at z == 0 (padded bins)


def _make_spec_kernel(tile_m, f_pad):
    """One fused MXU matmul per tile: rows [0, tile_m) = target frames, rows
    [tile_m, 2*tile_m) = (already sf-scaled) estimate frames. Emits lane-dense
    per-row L1 sums of the magnitude difference."""

    def kernel(fr_ref, basis_ref, out_ref):
        out = jnp.dot(fr_ref[...], basis_ref[...],
                      preferred_element_type=jnp.float32)        # (2*tile_m, 2*f_pad)
        t_re, t_im = out[:tile_m, :f_pad], out[:tile_m, f_pad:]
        e_re, e_im = out[tile_m:, :f_pad], out[tile_m:, f_pad:]
        t_mag = jnp.sqrt(t_re * t_re + t_im * t_im + _MAG_EPS)
        e_mag = jnp.sqrt(e_re * e_re + e_im * e_im + _MAG_EPS)
        diff = jnp.abs(e_mag - t_mag)
        out_ref[...] = jnp.sum(diff, axis=1)[None, :]             # (1, tile_m)

    return kernel


def _moments_kernel(t_ref, e_ref, dot_ref, ss_ref):
    """Per-batch running sums of e*t and e*e over row-chunk tiles."""
    @pl.when(pl.program_id(0) == 0)
    def _():
        dot_ref[...] = jnp.zeros_like(dot_ref)
        ss_ref[...] = jnp.zeros_like(ss_ref)

    t = t_ref[...]                                                # (B, tc, L)
    e = e_ref[...]
    dot_ref[...] += jnp.sum(jnp.sum(e * t, axis=2), axis=1)[:, None]
    ss_ref[...] += jnp.sum(jnp.sum(e * e, axis=2), axis=1)[:, None]


def _make_time_kernel(scale_invariant):
    """Per-batch running sum of |e*sf - t| over row-chunk tiles."""
    if scale_invariant:
        def kernel(t_ref, e_ref, sf_ref, out_ref):
            @pl.when(pl.program_id(0) == 0)
            def _():
                out_ref[...] = jnp.zeros_like(out_ref)
            d = jnp.abs(e_ref[...] * sf_ref[...][:, :, None] - t_ref[...])
            out_ref[...] += jnp.sum(jnp.sum(d, axis=2), axis=1)[:, None]
    else:
        def kernel(t_ref, e_ref, out_ref):
            @pl.when(pl.program_id(0) == 0)
            def _():
                out_ref[...] = jnp.zeros_like(out_ref)
            d = jnp.abs(e_ref[...] - t_ref[...])
            out_ref[...] += jnp.sum(jnp.sum(d, axis=2), axis=1)[:, None]
    return kernel


# --------------------------------- wrapper ------------------------------------

def multires_l1_spec_loss(target, estimate, window_sz=(512,), hop_sz=None,
                          eps=1e-8, time_domain_weight=0.5, scale_invariant=False):
    """JAX/Pallas equivalent of MultiResL1SpecLoss.forward. Returns a scalar."""
    assert target.shape == estimate.shape, (target.shape, estimate.shape)
    assert all(w % 2 == 0 for w in window_sz)
    # half-precision inputs are promoted to float32 (matches the torch module)
    target = target.astype(jnp.float32)
    estimate = estimate.astype(jnp.float32)
    B, T = target.shape
    if hop_sz is None:
        hop_sz = tuple(w // 2 for w in window_sz)

    vmem_cap = _vmem_capacity_bytes()
    big_vmem = vmem_cap >= (96 << 20)             # v5e/v6e: 128 MiB, v7x: 64 MiB

    # -------------- time-domain part: (B, rows, L) lane-dense tiles --------------
    L = min(1024, _round_up(T, 128))              # lanes per row chunk
    rpb = -(-T // L)                              # rows per batch (ceil)
    tc = rpb if rpb <= 64 else 64                 # rows per grid step
    rpb_pad = _round_up(rpb, tc)
    n_ct = rpb_pad // tc
    T_pad = rpb_pad * L                           # minimal zero padding
    tgt3 = jnp.pad(target, ((0, 0), (0, T_pad - T))).reshape(B, rpb_pad, L)
    est3 = jnp.pad(estimate, ((0, 0), (0, T_pad - T))).reshape(B, rpb_pad, L)

    sig_spec = pl.BlockSpec((B, tc, L), lambda i: (0, i, 0))
    bcol_spec = pl.BlockSpec((B, 1), lambda i: (0, 0))
    t_block = B * tc * L * 4
    time_cp = pltpu.CompilerParams(
        dimension_semantics=("arbitrary",),
        vmem_limit_bytes=int(min(max(6 * t_block + (1 << 20), 4 << 20), 32 << 20)),
    )
    time_cost = pl.CostEstimate(flops=int(4 * B * T_pad), transcendentals=0,
                                bytes_accessed=int(2 * B * T_pad * 4 + 2 * B * 4))

    if scale_invariant:
        dot, ss = pl.pallas_call(
            _moments_kernel,
            out_shape=(jax.ShapeDtypeStruct((B, 1), jnp.float32),
                       jax.ShapeDtypeStruct((B, 1), jnp.float32)),
            grid=(n_ct,),
            in_specs=[sig_spec, sig_spec],
            out_specs=(bcol_spec, bcol_spec),
            compiler_params=time_cp,
            cost_estimate=time_cost,
        )(tgt3, est3)
        sf = dot / (ss + eps)                     # (B, 1) scalar glue
    else:
        sf = None

    time_inputs = [tgt3, est3] + ([sf] if scale_invariant else [])
    time_specs = [sig_spec, sig_spec] + ([bcol_spec] if scale_invariant else [])
    time_sums = pl.pallas_call(
        _make_time_kernel(scale_invariant),
        out_shape=jax.ShapeDtypeStruct((B, 1), jnp.float32),
        grid=(n_ct,),
        in_specs=time_specs,
        out_specs=bcol_spec,
        compiler_params=time_cp,
        cost_estimate=time_cost,
    )(*time_inputs)
    time_loss = jnp.sum(time_sums) / (B * T)      # mean over batch & time

    if len(window_sz) == 0:
        return time_loss

    # ----------- multi-resolution spectral part (tiled over frames) -----------
    # |STFT(sf*x)| = |sf|*|STFT(x)|: scale the estimate at frame-build time (fused
    # into the bf16 cast + gather) so the MXU kernel needs no sf input.
    est_stft = estimate * sf if scale_invariant else estimate

    spec_loss = jnp.float32(0.0)
    for w, h in zip(window_sz, hop_sz):
        F_true = w // 2 + 1
        F_pad = _round_up(F_true, 128)            # lane-dense re/im split
        n_frames = T // h + 1
        M = B * n_frames
        if big_vmem:                              # 128 MiB VMEM (v5e / v6e)
            tile_cap = 1024 if w <= 512 else 512
        else:                                     # 64 MiB VMEM (v7x)
            tile_cap = 256 if w < 1024 else 128
        tile_m = max(128, min(tile_cap, _round_up(M, 128)))
        M_pad = _round_up(M, tile_m)
        n_tiles = M_pad // tile_m

        basis = _fused_basis(w, F_pad)                            # (w, 2*F_pad) bf16
        frames = _stacked_frames(target, est_stft, w, h, tile_m, M_pad)

        if _single_buffer_ok():                   # constant operand -> 1 VMEM copy
            basis_spec = pl.BlockSpec((w, 2 * F_pad), lambda i: (0, 0),
                                      pipeline_mode=pl.Buffered(1))
            basis_bufs = 1
        else:
            basis_spec = pl.BlockSpec((w, 2 * F_pad), lambda i: (0, 0))
            basis_bufs = 2

        vmem_bytes = int(
            basis_bufs * w * 2 * F_pad * 2        # VMEM-resident bf16 basis
            + 2 * (2 * tile_m) * w * 2            # double-buffered stacked frame tiles
            + (2 * tile_m) * (2 * F_pad) * 4      # f32 matmul result
            + 4 * tile_m * F_pad * 4              # magnitude / diff temporaries
            + 2 * tile_m * 4                      # output blocks
        )
        limit_cap = (96 << 20) if big_vmem else (40 << 20)
        cparams = pltpu.CompilerParams(
            dimension_semantics=("parallel",),    # each step owns its own out block
            vmem_limit_bytes=int(min(max(vmem_bytes * 3 // 2, 8 << 20), limit_cap)),
        )
        cost = pl.CostEstimate(
            flops=int(2 * (2 * M_pad) * w * (2 * F_pad)),
            transcendentals=int(2 * M_pad * F_pad),
            bytes_accessed=int(2 * M_pad * w * 2 + w * 2 * F_pad * 2
                               + n_tiles * tile_m * 4),
        )

        row_sums = pl.pallas_call(
            _make_spec_kernel(tile_m, F_pad),
            out_shape=jax.ShapeDtypeStruct((n_tiles, tile_m), jnp.float32),
            grid=(n_tiles,),
            in_specs=[pl.BlockSpec((2 * tile_m, w), lambda i: (i, 0)), basis_spec],
            out_specs=pl.BlockSpec((1, tile_m), lambda i: (i, 0)),
            compiler_params=cparams,
            cost_estimate=cost,
        )(frames, basis)

        # zero-padded rows / freq columns contribute exactly 0 -> true-count mean
        spec_loss = spec_loss + jnp.sum(row_sums) / (B * n_frames * F_true)

    return (time_domain_weight * time_loss
            + (1.0 - time_domain_weight) * spec_loss / len(window_sz))


# ------------------------------ reference (jnp) -------------------------------

def _ref_loss(target, estimate, window_sz, hop_sz, eps, time_domain_weight,
              scale_invariant):
    target = target.astype(jnp.float32)
    estimate = estimate.astype(jnp.float32)
    if scale_invariant:
        sf = (jnp.sum(estimate * target, -1, keepdims=True)
              / (jnp.sum(estimate * estimate, -1, keepdims=True) + eps))
    else:
        sf = 1.0
    est_s = estimate * sf
    tl = jnp.mean(jnp.abs(est_s - target), axis=-1)
    if len(window_sz) == 0:
        return jnp.mean(tl)
    sl = jnp.zeros_like(tl)
    for w, h in zip(window_sz, hop_sz):
        win = _hann_window(w)
        tm = jnp.abs(jnp.fft.rfft(_frame(target, w, h) * win, axis=-1))
        em = jnp.abs(jnp.fft.rfft(_frame(est_s, w, h) * win, axis=-1))
        sl = sl + jnp.mean(jnp.abs(em - tm), axis=(1, 2))
    total = tl * time_domain_weight + (1.0 - time_domain_weight) * sl / len(window_sz)
    return jnp.mean(total)


# ---------------------------------- main --------------------------------------

if __name__ == "__main__":
    key = jax.random.PRNGKey(0)
    k1, k2 = jax.random.split(key)

    B, T = 2, 256
    window_sz = (32, 64)               # small multi-resolution config
    hop_sz = tuple(w // 2 for w in window_sz)

    target = jax.random.normal(k1, (B, T), dtype=jnp.float32)
    estimate = target + 0.1 * jax.random.normal(k2, (B, T), dtype=jnp.float32)

    for si in (False, True):
        loss = multires_l1_spec_loss(target, estimate, window_sz=window_sz,
                                     hop_sz=hop_sz, time_domain_weight=0.5,
                                     scale_invariant=si)
        loss = jax.block_until_ready(loss)
        ref = _ref_loss(target, estimate, window_sz, hop_sz, 1e-8, 0.5, si)
        assert jnp.isfinite(loss), (si, float(loss))
        # bf16 MXU frames/basis introduce a small, expected drift vs the f32 FFT ref
        assert abs(float(loss) - float(ref)) < 3e-2 * abs(float(ref)) + 3e-3, \
            (si, float(loss), float(ref))

    print("KERNEL_OK")
</pallas_src>

<mosaic_0001>
module attributes {stable_mosaic.version = 11 : i64} {
  func.func @kernel(%arg0: i32, %arg1: memref<2x1x256xf32, #tpu.memory_space<vmem>>, %arg2: memref<2x1x256xf32, #tpu.memory_space<vmem>>, %arg3: memref<2x1xf32, #tpu.memory_space<vmem>>) attributes {dimension_semantics = [#tpu.dimension_semantics<arbitrary>], iteration_bounds = array<i64: 1>, scalar_prefetch = 0 : i64, scratch_operands = 0 : i64, tpu.core_type = #tpu.core_type<tc>, window_params = [{transform_indices = @transform_0, window_bounds = array<i64: 2, 1, 256>}, {transform_indices = @transform_1, window_bounds = array<i64: 2, 1, 256>}, {pipeline_mode = #tpu.pipeline_mode<synchronous>, transform_indices = @transform_2, window_bounds = array<i64: 2, 1>}]} {
    %c0_i32 = arith.constant 0 : i32
    %0 = arith.cmpi eq, %arg0, %c0_i32 : i32
    %1 = arith.extui %0 : i1 to i32
    %c0_i32_0 = arith.constant 0 : i32
    %2 = arith.cmpi ne, %1, %c0_i32_0 : i32
    scf.if %2 {
      %cst_11 = arith.constant 0.000000e+00 : f32
      %13 = vector.broadcast %cst_11 : f32 to vector<2x1xf32>
      %c0_12 = arith.constant 0 : index
      %c0_13 = arith.constant 0 : index
      %14 = vector.load %arg3[%c0_12, %c0_13] : memref<2x1xf32, #tpu.memory_space<vmem>>, vector<2x1xf32>
      tpu.vector_store %arg3[%c0_12, %c0_13], %13 {strides = array<i32>} : memref<2x1xf32, #tpu.memory_space<vmem>>, vector<2x1xf32>,
    } else {
    }
    %c0 = arith.constant 0 : index
    %c0_1 = arith.constant 0 : index
    %c0_2 = arith.constant 0 : index
    %3 = vector.load %arg2[%c0, %c0_1, %c0_2] : memref<2x1x256xf32, #tpu.memory_space<vmem>>, vector<2x1x256xf32>
    %c0_3 = arith.constant 0 : index
    %c0_4 = arith.constant 0 : index
    %c0_5 = arith.constant 0 : index
    %4 = vector.load %arg1[%c0_3, %c0_4, %c0_5] : memref<2x1x256xf32, #tpu.memory_space<vmem>>, vector<2x1x256xf32>
    %5 = arith.subf %3, %4 : vector<2x1x256xf32>
    %6 = math.absf %5 : vector<2x1x256xf32>
    %c0_6 = arith.constant 0 : index
    %c0_7 = arith.constant 0 : index
    %7 = vector.load %arg3[%c0_6, %c0_7] : memref<2x1xf32, #tpu.memory_space<vmem>>, vector<2x1xf32>
    %cst = arith.constant dense<0.000000e+00> : vector<2x1xf32>
    %8 = vector.multi_reduction <add>, %6, %cst [2] : vector<2x1x256xf32> to vector<2x1xf32>
    %cst_8 = arith.constant dense<0.000000e+00> : vector<2xf32>
    %9 = vector.multi_reduction <add>, %8, %cst_8 [1] : vector<2x1xf32> to vector<2xf32>
    %10 = vector.shape_cast %9 : vector<2xf32> to vector<2x1xf32>
    %11 = arith.addf %7, %10 : vector<2x1xf32>
    %c0_9 = arith.constant 0 : index
    %c0_10 = arith.constant 0 : index
    %12 = vector.load %arg3[%c0_9, %c0_10] : memref<2x1xf32, #tpu.memory_space<vmem>>, vector<2x1xf32>
    tpu.vector_store %arg3[%c0_9, %c0_10], %11 {strides = array<i32>} : memref<2x1xf32, #tpu.memory_space<vmem>>, vector<2x1xf32>,
    return
  }
  func.func @transform_0(%arg0: i32) -> (i32, i32, i32) {
    %c0_i32 = arith.constant 0 : i32
    %c0_i32_0 = arith.constant 0 : i32
    %c0_i32_1 = arith.constant 0 : i32
    return %c0_i32, %arg0, %c0_i32_0 : i32, i32, i32
  }
  func.func @transform_1(%arg0: i32) -> (i32, i32, i32) {
    %c0_i32 = arith.constant 0 : i32
    %c0_i32_0 = arith.constant 0 : i32
    %c0_i32_1 = arith.constant 0 : i32
    return %c0_i32, %arg0, %c0_i32_0 : i32, i32, i32
  }
  func.func @transform_2(%arg0: i32) -> (i32, i32) {
    %c0_i32 = arith.constant 0 : i32
    %c0_i32_0 = arith.constant 0 : i32
    %c0_i32_1 = arith.constant 0 : i32
    return %c0_i32, %c0_i32_0 : i32, i32
  }
}

</mosaic_0001>

<bundles_post_ra>
// kernel: tpu_custom_call.1
= control target key start
LH: loop header
LB: loop body
LE: loop exit
PB: predicated region body
PF: predicated region fallthrough
CT: control target
= control target key end

     0   :  { %7 = vsyncpa [#allocation3], 0  ;;  %s190_s0 = inlined_call_operand.hbm [shape: f32[2,1,256], index: 0, kind: input, shape index: {}]   ;;  %s191_s1 = inlined_call_operand.hbm [shape: f32[2,1,256], index: 1, kind: input, shape index: {}]   ;;  %s192_s2 = inlined_call_operand.vmem [shape: f32[2,1], index: 2, kind: output, shape index: {}]  }
   0x1   :  { %s13_s11 = sshll.u32 %s190_s0, 4  ;;  %s14_s11 = int_to_ptr.hbm [resolvable:$true] %s13_s11 }
   0x2   :  { %8 = vsyncpa [#allocation5], 0  ;;  %s153_s12 = smov [#allocation2]   ;;  %s26_s16 = sshll.u32 %s191_s1, 4  ;;  %s27_s16 = int_to_ptr.hbm [resolvable:$true] %s26_s16 }
   0x3   :  { %s15_s13 = sshll.u32 %s153_s12, 4  ;;  %s154_s17 = smov 32   ;;  %s16_s13 = int_to_ptr.vmem [resolvable:$true] %s15_s13 }
   0x4   :  { %s155_s18 = smov 2   ;;  %s156_s19 = smov [#allocation4]  }
   0x5   :  { %21 = dma.hbm_to_vmem [thread:$0]  %s14_s11, 64, %s16_s13, [#allocation3], %s154_s17, %s154_s17, %s155_s18  }
   0x6   :  { %s28_s20 = sshll.u32 %s156_s19, 4  ;;  %s29_s20 = int_to_ptr.vmem [resolvable:$true] %s28_s20 }
   0x7   :  { %34 = dma.hbm_to_vmem [thread:$0]  %s27_s16, 64, %s29_s20, [#allocation5], %s154_s17, %s154_s17, %s155_s18  }
   0x8   :  { %149 = dma.done.wait [#allocation3], 64  }
   0x9   :  { %150 = vsyncadd [#allocation3], 4294967232 }
   0xa   :  { %151 = dma.done.wait [#allocation5], 64  }
   0xb   :  { %152 = vsyncadd [#allocation5], 4294967232  ;;  %vm47_vm0 = vcmask 1024   ;;  %v157_v0 = vmov 0.0   ;;  %v50_v1 = vld [vmem:[#allocation4 + $0x2] sm:$0x3] }
   0xc   :  { %48 = vst.msk [vmem:[%s192_s2] sm:$0x3] %vm47_vm0, %v157_v0  ;;  %v52_v2 = vld [vmem:[#allocation2 + $0x2] sm:$0x3]  ;;  %v49_v3 = vld [vmem:[#allocation4] sm:$0x3] }
   0xd   :  { %v54_v4 = vsub.f32 %v50_v1, %v52_v2  ;;  %v51_v5 = vld [vmem:[#allocation2] sm:$0x3]  ;;  %vm68_vm1 = vcmask 1040384   ;;  %vm84_vm2 = vcmask 1041409  }
   0xe   :  { %v53_v6 = vsub.f32 %v49_v3, %v51_v5 }
   0xf   :  { %v56_v7 = vand.u32 2147483647, %v54_v4 }
  0x10   :  { %v55_v8 = vand.u32 2147483647, %v53_v6 }
  0x11   :  { %v62_v9 = vperm.slane %v56_v7, 0  ;;  %v63_v10 = vperm.slane %v56_v7, 1 }
  0x12   :  { %v60_v13 = vperm.slane %v55_v8, 0  ;;  %v61_v14 = vperm.slane %v55_v8, 1 }
  0x13   :  { %v74_v11 = vsel %vm68_vm1, %v62_v9, 0.0  ;;  %v75_v12 = vsel %vm68_vm1, %v63_v10, 0.0  ;;  %v57_v21 = vld [vmem:[%s192_s2] sm:$0x3] }
  0x14   :  { %v76_v15 = vadd.f32 %v75_v12, %v74_v11  ;;  %v69_v16 = vsel %vm68_vm1, %v60_v13, 0.0  ;;  %v70_v17 = vsel %vm68_vm1, %v61_v14, 0.0 }
  0x15   :  { %v71_v18 = vadd.f32 %v70_v17, %v69_v16 }
  0x16   :  { %77 = vadd.xlane.f32.xlu0 %v76_v15 }
  0x1e   :  { %72 = vadd.xlane.f32.xlu0 %v71_v18 }
  0x89   :  { %v78_v19 = vpop.xlane.xlu0 %77 }
  0x8a   :  { %v83_v20 = vrot.slane %v78_v19, 7 }
  0x91   :  { %v73_v22 = vpop.xlane.xlu0 %72 }
  0x92   :  { %v85_v23 = vsel %vm84_vm2, %v83_v20, %v73_v22 }
  0x93   :  { %v87_v24 = vadd.f32 %v85_v23, %v57_v21 }
  0x95   :  { %89 = vst.msk [vmem:[%s192_s2] sm:$0x3] %vm47_vm0, %v87_v24 }
  0x96   :  { %94 = vsyncpa [#allocation3], 1 }
  0x97   :  { %95 = vsyncpa [#allocation5], 1 }

</bundles_post_ra>
